<compile_context>
chip_gen: v7x
topology: tpu7x:2x2x1
jax: 0.10.0
libtpu: 0.0.40
codegen_flags: <defaults>
</compile_context>

<pallas_src>
import functools
import math

import jax
import jax.numpy as jnp
from jax.experimental import pallas as pl
from jax.experimental.pallas import tpu as pltpu

_LANES = 128
_VMEM_LIMIT = 48 * 1024 * 1024  # < v7x 64 MiB physical, > 16/32 MiB default scoped


# --------------------------------------------------------------------------
# helpers
# --------------------------------------------------------------------------
def _round_up(n, m):
    return ((n + m - 1) // m) * m


def _device_defaults():
    """(block_q, block_kv, row_tile) per TPU generation.

    v5e     : 4x128x128 MXU -> 128-wide attention tiles.
    v6e/v7x : 2x256x256 MXU -> 256-wide attention tiles (fills the MXU N dim).
    Phase-1 row tile 512 everywhere (big tiles amortize the ~0.35us/step
    overhead; measured ~85% of HBM roofline vs ~29% at 128-row tiles).
    """
    try:
        kind = jax.devices()[0].device_kind.lower()
    except Exception:
        kind = ""
    if "v5" in kind:
        return 128, 128, 512
    return 256, 256, 512


# --------------------------------------------------------------------------
# Phase 1: fused [Q|V] + K projections over all B*S rows (batch folded into M)
# --------------------------------------------------------------------------
def _qkv_proj_kernel(x_ref, y_ref, wqv_ref, bqv_ref, wk_ref, bk_ref,
                     q_ref, k_ref, v_ref, *, scale, dp):
    # bf16 MXU operands, f32 accumulation via preferred_element_type.
    x = x_ref[...].astype(jnp.bfloat16)          # (row_tile, in_ch)
    y = y_ref[...].astype(jnp.bfloat16)
    # Fused Q|V projection: a single N = 2*Dp matmul fills the 256-wide MXU
    # on v6e/v7x and pushes x through the MXU once instead of twice.
    qv = jnp.dot(x, wqv_ref[...], preferred_element_type=jnp.float32) + bqv_ref[...]
    q_ref[...] = (qv[:, :dp] * scale).astype(q_ref.dtype)  # fold 1/sqrt(head_dim) into Q
    v_ref[...] = qv[:, dp:].astype(v_ref.dtype)
    k = jnp.dot(y, wk_ref[...], preferred_element_type=jnp.float32) + bk_ref[...]
    k_ref[...] = k.astype(k_ref.dtype)


# --------------------------------------------------------------------------
# Phase 2: flash-style attention + fused final linear
# --------------------------------------------------------------------------
def _flash_attn_kernel(q_ref, k_ref, v_ref, wo_ref, bo_ref, o_ref,
                       m_scr, l_scr, acc_scr, *, kv_len, block_kv, mask_kv):
    ki = pl.program_id(2)

    @pl.when(ki == 0)
    def _init():
        m_scr[...] = jnp.full_like(m_scr, -jnp.inf)
        l_scr[...] = jnp.zeros_like(l_scr)
        acc_scr[...] = jnp.zeros_like(acc_scr)

    q = q_ref[0]                          # (block_q,  Dp) bf16, pre-scaled
    k = k_ref[0]                          # (block_kv, Dp) bf16
    v = v_ref[0]                          # (block_kv, Dp) bf16

    # q @ k^T, contracting the feature dim directly (bf16 MXU, f32 accum).
    s = jax.lax.dot_general(q, k, (((1,), (1,)), ((), ())),
                            preferred_element_type=jnp.float32)   # (bq, bkv) f32

    if mask_kv:
        # Sequence was zero-padded to the KV tile; mask padded key columns.
        col = ki * block_kv + jax.lax.broadcasted_iota(jnp.int32, s.shape, 1)
        s = jnp.where(col < kv_len, s, -1e30)

    m_prev = m_scr[...]
    m_new = jnp.maximum(m_prev, jnp.max(s, axis=-1, keepdims=True))
    alpha = jnp.exp(m_prev - m_new)
    p = jnp.exp(s - m_new)
    l_scr[...] = alpha * l_scr[...] + jnp.sum(p, axis=-1, keepdims=True)
    acc_scr[...] = alpha * acc_scr[...] + jnp.dot(
        p.astype(v.dtype), v, preferred_element_type=jnp.float32)
    m_scr[...] = m_new

    @pl.when(ki == pl.num_programs(2) - 1)
    def _finalize():
        # Exact divide: runs once per (batch, q-tile) outside the kv loop, so
        # there is nothing to hide it behind and the extra accuracy is free.
        ctx = acc_scr[...] / l_scr[...]
        o_ref[0] = jnp.dot(ctx.astype(wo_ref.dtype), wo_ref[...],
                           preferred_element_type=jnp.float32) + bo_ref[...]


# --------------------------------------------------------------------------
# wrapper
# --------------------------------------------------------------------------
def multi_head_attention(x, y, params, head_num=1, *,
                         block_q=None, block_kv=None, row_tile=None):
    # The torch module's forward only type-checks for head_num == 1.
    assert head_num == 1, "kernel (and the reference torch module) require head_num == 1"
    B, S, in_ch = x.shape
    By, Sy, in_ch_y = y.shape
    assert B == By and in_ch == in_ch_y
    # torch's matmul(p_attn, value) requires len(y) == len(x).
    assert Sy == S
    out_ch = params["wq"].shape[1]
    assert out_ch % head_num == 0
    head_dim = out_ch // head_num
    scale = 1.0 / math.sqrt(head_dim)

    dbq, dbkv, drt = _device_defaults()
    block_q = dbq if block_q is None else block_q
    block_kv = dbkv if block_kv is None else block_kv
    row_tile = drt if row_tile is None else row_tile

    # ---- lane-dense channel padding (out_ch -> multiple of 128) ------------
    Dp = _round_up(out_ch, _LANES)
    pad_c = Dp - out_ch

    def pad_cols(a):
        return jnp.pad(a, ((0, 0), (0, pad_c))) if pad_c else a

    wq, wk, wv = pad_cols(params["wq"]), pad_cols(params["wk"]), pad_cols(params["wv"])
    bq_p, bk_p, bv_p = pad_cols(params["bq"]), pad_cols(params["bk"]), pad_cols(params["bv"])
    wo = params["wo"]
    wo = jnp.pad(wo, ((0, pad_c), (0, pad_c))) if pad_c else wo
    bo_p = pad_cols(params["bo"])

    # Fused Q|V weights; MXU operands cast to bf16 once here (f32 accumulation
    # and f32 biases stay inside the kernels).
    wqv = jnp.concatenate([wq, wv], axis=1).astype(jnp.bfloat16)   # (in_ch, 2*Dp)
    bqv = jnp.concatenate([bq_p, bv_p], axis=1)                    # (1, 2*Dp) f32
    wk_b = wk.astype(jnp.bfloat16)
    wo_b = wo.astype(jnp.bfloat16)
    # TODO(synk): for very large out_ch on v7x (resident 3*in_ch*Dp or Dp*Dp
    # weight blocks approaching the 64 MiB VMEM), add an N-tiling grid axis
    # over Dp and pipeline_mode=pl.Buffered(1) on the constant weight specs.

    # ---- sequence / row padding so tiles never degenerate -------------------
    bq_t = min(_round_up(block_q, 8), _round_up(S, 8))
    bkv_t = min(_round_up(block_kv, 8), _round_up(S, 8))
    S_pad = _round_up(S, math.lcm(bq_t, bkv_t))
    pad_s = S_pad - S
    if pad_s:
        x = jnp.pad(x, ((0, 0), (0, pad_s), (0, 0)))
        y = jnp.pad(y, ((0, 0), (0, pad_s), (0, 0)))

    rows = B * S_pad
    rt = min(_round_up(row_tile, 8), rows)
    rows_pad = _round_up(rows, rt)
    n_row = rows_pad // rt
    x2 = x.reshape(rows, in_ch)
    y2 = y.reshape(rows, in_ch)
    if rows_pad != rows:
        x2 = jnp.pad(x2, ((0, rows_pad - rows), (0, 0)))
        y2 = jnp.pad(y2, ((0, rows_pad - rows), (0, 0)))

    # ---- phase 1: fused [Q|V] + K projections over flattened rows ----------
    q_full, k_full, v_full = pl.pallas_call(
        functools.partial(_qkv_proj_kernel, scale=scale, dp=Dp),
        out_shape=(
            jax.ShapeDtypeStruct((rows_pad, Dp), jnp.bfloat16),   # Q (scaled)
            jax.ShapeDtypeStruct((rows_pad, Dp), jnp.bfloat16),   # K
            jax.ShapeDtypeStruct((rows_pad, Dp), jnp.bfloat16),   # V
        ),
        grid_spec=pltpu.PrefetchScalarGridSpec(
            num_scalar_prefetch=0,
            grid=(n_row,),
            in_specs=[
                pl.BlockSpec((rt, in_ch), lambda r: (r, 0)),        # x rows
                pl.BlockSpec((rt, in_ch), lambda r: (r, 0)),        # y rows
                # Weights / biases: constant index map -> DMA'd once, resident.
                pl.BlockSpec((in_ch, 2 * Dp), lambda r: (0, 0)),    # [Wq | Wv]
                pl.BlockSpec((1, 2 * Dp), lambda r: (0, 0)),        # [bq | bv]
                pl.BlockSpec((in_ch, Dp), lambda r: (0, 0)),        # Wk
                pl.BlockSpec((1, Dp), lambda r: (0, 0)),            # bk
            ],
            out_specs=(
                pl.BlockSpec((rt, Dp), lambda r: (r, 0)),
                pl.BlockSpec((rt, Dp), lambda r: (r, 0)),
                pl.BlockSpec((rt, Dp), lambda r: (r, 0)),
            ),
        ),
        compiler_params=pltpu.CompilerParams(
            dimension_semantics=("parallel",),
            vmem_limit_bytes=_VMEM_LIMIT),
        cost_estimate=pl.CostEstimate(
            flops=2 * 3 * rows_pad * in_ch * Dp,
            transcendentals=0,
            bytes_accessed=(4 * 2 * rows_pad * in_ch      # x, y f32 in
                            + 2 * 3 * rows_pad * Dp       # Q/K/V bf16 out
                            + 2 * 3 * in_ch * Dp          # weights bf16
                            + 4 * 3 * Dp)),               # biases f32
    )(x2, y2, wqv, bqv, wk_b, bk_p)

    q3 = q_full[:rows].reshape(B, S_pad, Dp)
    k3 = k_full[:rows].reshape(B, S_pad, Dp)
    v3 = v_full[:rows].reshape(B, S_pad, Dp)

    # ---- phase 2: flash attention + fused final linear ----------------------
    n_q = S_pad // bq_t
    n_kv = S_pad // bkv_t
    # v7x megacore note: B * n_q parallel blocks feed the two TensorCores.

    out_p = pl.pallas_call(
        functools.partial(_flash_attn_kernel, kv_len=S, block_kv=bkv_t,
                          mask_kv=pad_s > 0),
        out_shape=jax.ShapeDtypeStruct((B, S_pad, Dp), jnp.float32),
        grid_spec=pltpu.PrefetchScalarGridSpec(
            num_scalar_prefetch=0,
            grid=(B, n_q, n_kv),                          # reduction (kv) axis last
            in_specs=[
                pl.BlockSpec((1, bq_t, Dp), lambda b, qi, ki: (b, qi, 0)),   # Q
                pl.BlockSpec((1, bkv_t, Dp), lambda b, qi, ki: (b, ki, 0)),  # K
                pl.BlockSpec((1, bkv_t, Dp), lambda b, qi, ki: (b, ki, 0)),  # V
                pl.BlockSpec((Dp, Dp), lambda b, qi, ki: (0, 0)),            # Wo
                pl.BlockSpec((1, Dp), lambda b, qi, ki: (0, 0)),             # bo
            ],
            out_specs=pl.BlockSpec((1, bq_t, Dp), lambda b, qi, ki: (b, qi, 0)),
            scratch_shapes=[
                pltpu.VMEM((bq_t, 1), jnp.float32),    # running max m
                pltpu.VMEM((bq_t, 1), jnp.float32),    # running sum l
                pltpu.VMEM((bq_t, Dp), jnp.float32),   # unnormalized ctx acc
            ],
        ),
        compiler_params=pltpu.CompilerParams(
            dimension_semantics=("parallel", "parallel", "arbitrary"),
            vmem_limit_bytes=_VMEM_LIMIT),
        cost_estimate=pl.CostEstimate(
            flops=B * (4 * S_pad * S_pad * Dp + 2 * S_pad * Dp * Dp),
            transcendentals=B * S_pad * S_pad + B * S_pad * n_kv,
            bytes_accessed=(2 * B * S_pad * Dp              # Q bf16, read once
                            + 2 * 2 * B * S_pad * Dp * n_q  # K+V bf16, re-read per q tile
                            + 4 * B * S_pad * Dp            # out f32
                            + 2 * Dp * Dp + 4 * Dp)),       # Wo bf16 + bo f32
    )(q3, k3, v3, wo_b, bo_p)

    # Strip sequence/channel padding; torch returns (B, S, head_num, out_ch).
    out = out_p[:, :S, :out_ch]
    return out.reshape(B, S, head_num, out_ch)


# --------------------------------------------------------------------------
# pure-JAX reference mirroring the PyTorch forward exactly
# --------------------------------------------------------------------------
def ref_forward(x, y, params, head_num=1):
    lin = lambda a, w, b: a @ w + b
    q = lin(x, params["wq"], params["bq"])
    k = lin(y, params["wk"], params["bk"])
    v = lin(x, params["wv"], params["bv"])
    B = x.shape[0]
    out_ch = q.shape[-1]
    hd = out_ch // head_num
    q = q.reshape(B, -1, head_num, hd).transpose(0, 2, 1, 3)
    k = k.reshape(B, -1, head_num, hd).transpose(0, 2, 1, 3)
    v = v.reshape(B, -1, head_num, hd).transpose(0, 2, 1, 3)
    scores = jnp.einsum("bhqd,bhkd->bhqk", q, k) / math.sqrt(hd)
    p = jax.nn.softmax(scores, axis=-1)
    ctx = jnp.einsum("bhqk,bhkd->bhqd", p, v)
    ctx = ctx.transpose(0, 2, 1, 3)                  # (B, S, H, hd)
    return lin(ctx, params["wo"], params["bo"])      # (B, S, H, out_ch)


def init_params(key, in_ch, out_ch):
    """Weights stored pre-transposed as (in_ch, out_ch); biases (1, out_ch)."""
    ks = jax.random.split(key, 8)
    bi, bo = 1.0 / math.sqrt(in_ch), 1.0 / math.sqrt(out_ch)
    u = jax.random.uniform
    return {
        "wq": u(ks[0], (in_ch, out_ch), jnp.float32, -bi, bi),
        "bq": u(ks[1], (1, out_ch), jnp.float32, -bi, bi),
        "wk": u(ks[2], (in_ch, out_ch), jnp.float32, -bi, bi),
        "bk": u(ks[3], (1, out_ch), jnp.float32, -bi, bi),
        "wv": u(ks[4], (in_ch, out_ch), jnp.float32, -bi, bi),
        "bv": u(ks[5], (1, out_ch), jnp.float32, -bi, bi),
        "wo": u(ks[6], (out_ch, out_ch), jnp.float32, -bo, bo),
        "bo": u(ks[7], (1, out_ch), jnp.float32, -bo, bo),
    }


if __name__ == "__main__":
    B, S, in_ch, out_ch, head_num = 2, 8, 32, 32, 1

    key = jax.random.PRNGKey(0)
    kx, ky, kp = jax.random.split(key, 3)
    x = jax.random.normal(kx, (B, S, in_ch), jnp.float32)
    y = jax.random.normal(ky, (B, S, in_ch), jnp.float32)
    params = init_params(kp, in_ch, out_ch)

    out = multi_head_attention(x, y, params, head_num=head_num)
    out = jax.block_until_ready(out)

    ref = ref_forward(x, y, params, head_num=head_num)
    assert out.shape == (B, S, head_num, out_ch)
    # Tolerance covers bf16 MXU operands and bf16 Q/K/V intermediates
    # (all accumulation is f32); real bugs produce O(0.1 - 1) errors.
    max_err = float(jnp.max(jnp.abs(out - ref)))
    assert max_err < 5e-2, f"max abs error {max_err}"

    print("KERNEL_OK")
</pallas_src>

<mosaic_0001>
module attributes {stable_mosaic.version = 11 : i64} {
  func.func @_qkv_proj_kernel(%arg0: i32, %arg1: memref<16x32xf32, #tpu.memory_space<vmem>>, %arg2: memref<16x32xf32, #tpu.memory_space<vmem>>, %arg3: memref<32x256xbf16, #tpu.memory_space<vmem>>, %arg4: memref<1x256xf32, #tpu.memory_space<vmem>>, %arg5: memref<32x128xbf16, #tpu.memory_space<vmem>>, %arg6: memref<1x128xf32, #tpu.memory_space<vmem>>, %arg7: memref<16x128xbf16, #tpu.memory_space<vmem>>, %arg8: memref<16x128xbf16, #tpu.memory_space<vmem>>, %arg9: memref<16x128xbf16, #tpu.memory_space<vmem>>) attributes {dimension_semantics = [#tpu.dimension_semantics<parallel>], iteration_bounds = array<i64: 1>, scalar_prefetch = 0 : i64, scratch_operands = 0 : i64, tpu.core_type = #tpu.core_type<tc>, window_params = [{transform_indices = @transform_0, window_bounds = array<i64: 16, 32>}, {transform_indices = @transform_1, window_bounds = array<i64: 16, 32>}, {pipeline_mode = #tpu.pipeline_mode<synchronous>, transform_indices = @transform_2, window_bounds = array<i64: 32, 256>}, {pipeline_mode = #tpu.pipeline_mode<synchronous>, transform_indices = @transform_3, window_bounds = array<i64: 1, 256>}, {pipeline_mode = #tpu.pipeline_mode<synchronous>, transform_indices = @transform_4, window_bounds = array<i64: 32, 128>}, {pipeline_mode = #tpu.pipeline_mode<synchronous>, transform_indices = @transform_5, window_bounds = array<i64: 1, 128>}, {transform_indices = @transform_6, window_bounds = array<i64: 16, 128>}, {transform_indices = @transform_7, window_bounds = array<i64: 16, 128>}, {transform_indices = @transform_8, window_bounds = array<i64: 16, 128>}]} {
    %c0 = arith.constant 0 : index
    %c0_0 = arith.constant 0 : index
    %0 = vector.load %arg1[%c0, %c0_0] : memref<16x32xf32, #tpu.memory_space<vmem>>, vector<16x32xf32>
    %1 = arith.truncf %0 : vector<16x32xf32> to vector<16x32xbf16>
    %c0_1 = arith.constant 0 : index
    %c0_2 = arith.constant 0 : index
    %2 = vector.load %arg2[%c0_1, %c0_2] : memref<16x32xf32, #tpu.memory_space<vmem>>, vector<16x32xf32>
    %3 = arith.truncf %2 : vector<16x32xf32> to vector<16x32xbf16>
    %c0_3 = arith.constant 0 : index
    %c0_4 = arith.constant 0 : index
    %4 = vector.load %arg3[%c0_3, %c0_4] : memref<32x256xbf16, #tpu.memory_space<vmem>>, vector<32x256xbf16>
    %cst = arith.constant dense<0.000000e+00> : vector<16x256xf32>
    %5 = tpu.matmul %1, %4, %cst {dimension_numbers = #tpu.dot_dimension_numbers<[1], [0], [0], [1], [0, 0, 1, 1], [], []>} : vector<16x32xbf16>, vector<32x256xbf16>, vector<16x256xf32> -> vector<16x256xf32>
    %c0_5 = arith.constant 0 : index
    %c0_6 = arith.constant 0 : index
    %6 = vector.load %arg4[%c0_5, %c0_6] : memref<1x256xf32, #tpu.memory_space<vmem>>, vector<1x256xf32>
    %7 = vector.broadcast %6 : vector<1x256xf32> to vector<16x256xf32>
    %8 = arith.addf %5, %7 : vector<16x256xf32>
    %9 = vector.extract_strided_slice %8 {offsets = [0, 0], sizes = [16, 128], strides = [1, 1]} : vector<16x256xf32> to vector<16x128xf32>
    %cst_7 = arith.constant 0.176776692 : f32
    %10 = vector.broadcast %cst_7 : f32 to vector<16x128xf32>
    %11 = arith.mulf %9, %10 : vector<16x128xf32>
    %12 = arith.truncf %11 : vector<16x128xf32> to vector<16x128xbf16>
    %c0_8 = arith.constant 0 : index
    %c0_9 = arith.constant 0 : index
    %13 = vector.load %arg7[%c0_8, %c0_9] : memref<16x128xbf16, #tpu.memory_space<vmem>>, vector<16x128xbf16>
    tpu.vector_store %arg7[%c0_8, %c0_9], %12 {strides = array<i32>} : memref<16x128xbf16, #tpu.memory_space<vmem>>, vector<16x128xbf16>,
    %14 = vector.extract_strided_slice %8 {offsets = [0, 128], sizes = [16, 128], strides = [1, 1]} : vector<16x256xf32> to vector<16x128xf32>
    %15 = arith.truncf %14 : vector<16x128xf32> to vector<16x128xbf16>
    %c0_10 = arith.constant 0 : index
    %c0_11 = arith.constant 0 : index
    %16 = vector.load %arg9[%c0_10, %c0_11] : memref<16x128xbf16, #tpu.memory_space<vmem>>, vector<16x128xbf16>
    tpu.vector_store %arg9[%c0_10, %c0_11], %15 {strides = array<i32>} : memref<16x128xbf16, #tpu.memory_space<vmem>>, vector<16x128xbf16>,
    %c0_12 = arith.constant 0 : index
    %c0_13 = arith.constant 0 : index
    %17 = vector.load %arg5[%c0_12, %c0_13] : memref<32x128xbf16, #tpu.memory_space<vmem>>, vector<32x128xbf16>
    %cst_14 = arith.constant dense<0.000000e+00> : vector<16x128xf32>
    %18 = tpu.matmul %3, %17, %cst_14 {dimension_numbers = #tpu.dot_dimension_numbers<[1], [0], [0], [1], [0, 0, 1, 1], [], []>} : vector<16x32xbf16>, vector<32x128xbf16>, vector<16x128xf32> -> vector<16x128xf32>
    %c0_15 = arith.constant 0 : index
    %c0_16 = arith.constant 0 : index
    %19 = vector.load %arg6[%c0_15, %c0_16] : memref<1x128xf32, #tpu.memory_space<vmem>>, vector<1x128xf32>
    %20 = vector.broadcast %19 : vector<1x128xf32> to vector<16x128xf32>
    %21 = arith.addf %18, %20 : vector<16x128xf32>
    %22 = arith.truncf %21 : vector<16x128xf32> to vector<16x128xbf16>
    %c0_17 = arith.constant 0 : index
    %c0_18 = arith.constant 0 : index
    %23 = vector.load %arg8[%c0_17, %c0_18] : memref<16x128xbf16, #tpu.memory_space<vmem>>, vector<16x128xbf16>
    tpu.vector_store %arg8[%c0_17, %c0_18], %22 {strides = array<i32>} : memref<16x128xbf16, #tpu.memory_space<vmem>>, vector<16x128xbf16>,
    return
  }
  func.func @transform_0(%arg0: i32) -> (i32, i32) {
    %c0_i32 = arith.constant 0 : i32
    %c0_i32_0 = arith.constant 0 : i32
    return %arg0, %c0_i32 : i32, i32
  }
  func.func @transform_1(%arg0: i32) -> (i32, i32) {
    %c0_i32 = arith.constant 0 : i32
    %c0_i32_0 = arith.constant 0 : i32
    return %arg0, %c0_i32 : i32, i32
  }
  func.func @transform_2(%arg0: i32) -> (i32, i32) {
    %c0_i32 = arith.constant 0 : i32
    %c0_i32_0 = arith.constant 0 : i32
    %c0_i32_1 = arith.constant 0 : i32
    return %c0_i32, %c0_i32_0 : i32, i32
  }
  func.func @transform_3(%arg0: i32) -> (i32, i32) {
    %c0_i32 = arith.constant 0 : i32
    %c0_i32_0 = arith.constant 0 : i32
    %c0_i32_1 = arith.constant 0 : i32
    return %c0_i32, %c0_i32_0 : i32, i32
  }
  func.func @transform_4(%arg0: i32) -> (i32, i32) {
    %c0_i32 = arith.constant 0 : i32
    %c0_i32_0 = arith.constant 0 : i32
    %c0_i32_1 = arith.constant 0 : i32
    return %c0_i32, %c0_i32_0 : i32, i32
  }
  func.func @transform_5(%arg0: i32) -> (i32, i32) {
    %c0_i32 = arith.constant 0 : i32
    %c0_i32_0 = arith.constant 0 : i32
    %c0_i32_1 = arith.constant 0 : i32
    return %c0_i32, %c0_i32_0 : i32, i32
  }
  func.func @transform_6(%arg0: i32) -> (i32, i32) {
    %c0_i32 = arith.constant 0 : i32
    %c0_i32_0 = arith.constant 0 : i32
    return %arg0, %c0_i32 : i32, i32
  }
  func.func @transform_7(%arg0: i32) -> (i32, i32) {
    %c0_i32 = arith.constant 0 : i32
    %c0_i32_0 = arith.constant 0 : i32
    return %arg0, %c0_i32 : i32, i32
  }
  func.func @transform_8(%arg0: i32) -> (i32, i32) {
    %c0_i32 = arith.constant 0 : i32
    %c0_i32_0 = arith.constant 0 : i32
    return %arg0, %c0_i32 : i32, i32
  }
}

</mosaic_0001>

<bundles_post_ra>
// kernel: tpu_custom_call.1
= control target key start
LH: loop header
LB: loop body
LE: loop exit
PB: predicated region body
PF: predicated region fallthrough
CT: control target
= control target key end

     0   :  { %14 = vsyncpa [#allocation3], 0  ;;  %s753_s0 = inlined_call_operand.hbm [shape: f32[16,32], index: 0, kind: input, shape index: {}]   ;;  %s754_s1 = inlined_call_operand.hbm [shape: f32[16,32], index: 1, kind: input, shape index: {}]   ;;  %s755_s2 = inlined_call_operand.hbm [shape: bf16[32,256], index: 2, kind: input, shape index: {}]   ;;  %s756_s3 = inlined_call_operand.vmem [shape: f32[1,256], index: 3, kind: input, shape index: {}]   ;;  %s757_s4 = inlined_call_operand.hbm [shape: bf16[32,128], index: 4, kind: input, shape index: {}]   ;;  %s758_s5 = inlined_call_operand.vmem [shape: f32[1,128], index: 5, kind: input, shape index: {}]   ;;  %s759_s6 = inlined_call_operand.hbm [shape: bf16[16,128], index: 6, kind: output, shape index: {0}]   ;;  %s760_s7 = inlined_call_operand.hbm [shape: bf16[16,128], index: 7, kind: output, shape index: {1}]   ;;  %s761_s8 = inlined_call_operand.hbm [shape: bf16[16,128], index: 8, kind: output, shape index: {2}]  }
   0x1   :  { %15 = vsyncpa [#allocation6], 0 }
   0x2   :  { %16 = vsyncpa [#allocation9], 0 }
   0x3   :  { %17 = vsyncpa [#allocation4], 0 }
   0x4   :  { %18 = vsyncpa [#allocation12], 0  ;;  %s555_s27 = smov [#allocation5]   ;;  %s556_s29 = smov [#allocation2]  }
   0x5   :  { %s36_s28 = sshll.u32 %s555_s27, 4  ;;  %s24_s30 = sshll.u32 %s556_s29, 4  ;;  %s37_s28 = int_to_ptr.vmem [resolvable:$true] %s36_s28  ;;  %s614_s30 = int_to_ptr.vmem [resolvable:$true] %s24_s30 }
   0x6   :  { %s391_s11 = scalar_lea.hbm %s754_s1, 256 }
   0x7   :  { %p392_p0 = scmp.ne.s32.totalorder %s754_s1, %s391_s11  ;;  %p395_p1 = scmp.lt.u32.totalorder %s391_s11, %s754_s1 }
   0x9   :  { %p397_p2 = pnand %p395_p1, %p392_p0 }
   0xb   :  { %400 = shalt.err (!%p397_p2)
}
   0xc   :  { %s401_s16 = scalar_lea.vmem %s37_s28, 256  ;;  %p406_p4 = scmp.lt.s32.totalorder %s37_s28, %s37_s28 }
   0xd   :  { %p402_p3 = scmp.ne.s32.totalorder %s37_s28, %s401_s16  ;;  %p407_p5 = scmp.lt.s32.totalorder %s401_s16, %s401_s16 }
   0xf   :  { %p408_p6 = por %p407_p5, %p406_p4 }
  0x11   :  { %p409_p7 = pnand %p408_p6, %p402_p3 }
  0x13   :  { %412 = shalt.err (!%p409_p7)
}
  0x14   :  { %s557_s17 = smov 128   ;;  %s558_s18 = smov 8  }
  0x15   :  { %42 = dma.hbm_to_vmem [thread:$0]  %s754_s1, 256, %s37_s28, [#allocation6], %s557_s17, %s557_s17, %s558_s18  }
  0x16   :  { %s413_s23 = scalar_lea.hbm %s753_s0, 256 }
  0x17   :  { %p414_p8 = scmp.ne.s32.totalorder %s753_s0, %s413_s23  ;;  %p417_p9 = scmp.lt.u32.totalorder %s413_s23, %s753_s0 }
  0x19   :  { %p419_p10 = pnand %p417_p9, %p414_p8 }
  0x1b   :  { %422 = shalt.err (!%p419_p10)
}
  0x1c   :  { %s423_s29 = scalar_lea.vmem %s614_s30, 256  ;;  %p428_p12 = scmp.lt.s32.totalorder %s614_s30, %s614_s30 }
  0x1d   :  { %p424_p11 = scmp.ne.s32.totalorder %s614_s30, %s423_s29  ;;  %p429_p13 = scmp.lt.s32.totalorder %s423_s29, %s423_s29 }
  0x1f   :  { %p430_p0 = por %p429_p13, %p428_p12 }
  0x21   :  { %p431_p1 = pnand %p430_p0, %p424_p11 }
  0x23   :  { %434 = shalt.err (!%p431_p1)
}
  0x24   :  { %30 = dma.hbm_to_vmem [thread:$0]  %s753_s0, 256, %s614_s30, [#allocation3], %s557_s17, %s557_s17, %s558_s18  }
  0x25   :  { %s559_s9 = smov [#allocation7]   ;;  %s560_s11 = smov [#allocation8]  }
  0x26   :  { %s48_s10 = sshll.u32 %s559_s9, 4  ;;  %s62_s12 = sshll.u32 %s560_s11, 4  ;;  %s49_s10 = int_to_ptr.vmem [resolvable:$true] %s48_s10  ;;  %s651_s12 = int_to_ptr.vmem [resolvable:$true] %s62_s12 }
  0x27   :  { %s435_s15 = scalar_lea.hbm %s755_s2, 512 }
  0x28   :  { %p436_p2 = scmp.ne.s32.totalorder %s755_s2, %s435_s15  ;;  %p439_p3 = scmp.lt.u32.totalorder %s435_s15, %s755_s2 }
  0x2a   :  { %p441_p4 = pnand %p439_p3, %p436_p2 }
  0x2c   :  { %444 = shalt.err (!%p441_p4)
}
  0x2d   :  { %s445_s0 = scalar_lea.vmem %s49_s10, 512  ;;  %p450_p6 = scmp.lt.s32.totalorder %s49_s10, %s49_s10 }
  0x2e   :  { %p446_p5 = scmp.ne.s32.totalorder %s49_s10, %s445_s0  ;;  %p451_p7 = scmp.lt.s32.totalorder %s445_s0, %s445_s0 }
  0x30   :  { %p452_p8 = por %p451_p7, %p450_p6 }
  0x32   :  { %p453_p9 = pnand %p452_p8, %p446_p5 }
  0x34   :  { %456 = shalt.err (!%p453_p9)
}
  0x35   :  { %54 = dma.hbm_to_vmem [thread:$0]  %s755_s2, 512, %s49_s10, [#allocation6], %s557_s17, %s557_s17, %s558_s18  }
  0x36   :  { %s457_s25 = scalar_lea.hbm %s757_s4, 256 }
  0x37   :  { %p458_p10 = scmp.ne.s32.totalorder %s757_s4, %s457_s25  ;;  %p461_p11 = scmp.lt.u32.totalorder %s457_s25, %s757_s4 }
  0x39   :  { %p463_p12 = pnand %p461_p11, %p458_p10 }
  0x3b   :  { %466 = shalt.err (!%p463_p12)
}
  0x3c   :  { %s467_s28 = scalar_lea.vmem %s651_s12, 256  ;;  %p472_p0 = scmp.lt.s32.totalorder %s651_s12, %s651_s12 }
  0x3d   :  { %p468_p13 = scmp.ne.s32.totalorder %s651_s12, %s467_s28  ;;  %p473_p1 = scmp.lt.s32.totalorder %s467_s28, %s467_s28 }
  0x3f   :  { %p474_p2 = por %p473_p1, %p472_p0 }
  0x41   :  { %p475_p3 = pnand %p474_p2, %p468_p13 }
  0x43   :  { %478 = shalt.err (!%p475_p3)
}
  0x44   :  { %s561_s2 = smov 64   ;;  %s562_s17 = smov 4  }
  0x45   :  { %68 = dma.hbm_to_vmem [thread:$0]  %s757_s4, 256, %s651_s12, [#allocation9], %s561_s2, %s561_s2, %s562_s17  }
  0x46   :  { %545 = dma.done.wait [#allocation3], 256  }
  0x47   :  { %546 = vsyncadd [#allocation3], 4294967040 }
  0x48   :  { %547 = dma.done.wait [#allocation6], 768  }
  0x49   :  { %548 = vsyncadd [#allocation6], 4294966528 }
  0x4a   :  { %549 = dma.done.wait [#allocation9], 256  }
  0x4b   :  { %550 = vsyncadd [#allocation9], 4294967040  ;;  %v563_v0 = vmov 0.0   ;;  %vm564_vm0 = vmmov 0   ;;  %v565_v1 = vmov 0   ;;  %v385_v3 = vld [vmem:[#allocation8] sm:$0xff]   ;;  %v96_v14 = vlaneseq }
  0x4c   :  { %361 = vmatprep.subr.bf16.mxu1 %v563_v0  ;;  %365 = vmatprep.mubr.msk.bf16.mxu1 %vm564_vm0, %v563_v0  ;;  %v383_v2 = vld [vmem:[#allocation7 + $0x4] ss:$8 sps:$4 sm:$0xff]   ;;  %v386_v4 = vld [vmem:[#allocation7] ss:$8 sps:$4 sm:$0xff]   ;;  %v387_v5 = vld [vmem:[#allocation7 + $0x14] ss:$8 sps:$4 sm:$0xff]  }
  0x4d   :  { %162 = vmatprep.mubr.bf16.mxu0 %v565_v1  ;;  %130 = vmatprep.subr.bf16.mxu0 %v383_v2  ;;  %v389_v6 = vld [vmem:[#allocation8 + $0x8] sm:$0xff]   ;;  %v390_v7 = vld [vmem:[#allocation7 + $0x10] ss:$8 sps:$4 sm:$0xff]   ;;  %v84_v10 = vld [vmem:[#allocation2] sm:$0xff]  ;;  %vm126_vm1 = vcmask 261120   ;;  %v97_v15 = vshrl.u32 %v96_v14, 7 }
  0x4e   :  { %362 = vmatpush3.bf16.msra.mxu1 %v385_v3  ;;  %131 = vmatpush1.bf16.msra.mxu0 %v386_v4  ;;  %v87_v8 = vld [vmem:[#allocation5] sm:$0xff]  ;;  %v88_v9 = vld [vmem:[#allocation5 + $0x8] sm:$0xff]  ;;  %v85_v11 = vld [vmem:[#allocation2 + $0x8] sm:$0xff]  ;;  %s566_s13 = smov [#allocation11]   ;;  %s568_s16 = smov [#allocation13]  }
  0x4f   :  { %363 = vmatprep.subr.bf16.mxu1 %v563_v0  ;;  %132 = vmatprep.subr.bf16.mxu0 %v387_v5  ;;  %v89_v12 = vpack.c.bf16 %v88_v9, %v87_v8  ;;  %v86_v13 = vpack.c.bf16 %v85_v11, %v84_v10  ;;  %v98_v16 = vsub.s32 0, %v97_v15  ;;  %v94_v17 = vld [vmem:[%s756_s3] sm:$0x3]  ;;  %v102_v18 = vsub.s32 1, %v97_v15  ;;  %s289_s14 = sshll.u32 %s566_s13, 4  ;;  %s567_s3 = smov [#allocation10]   ;;  %s290_s14 = int_to_ptr.vmem [resolvable:$true] %s289_s14 }
  0x50   :  { %v331_v19 = vld [vmem:[%s758_s5] ss:$0 sm:$0xff]  ;;  %s277_s15 = sshll.u32 %s567_s3, 4  ;;  %s301_s5 = sshll.u32 %s568_s16, 4  ;;  %s694_s15 = int_to_ptr.vmem [resolvable:$true] %s277_s15  ;;  %s696_s5 = int_to_ptr.vmem [resolvable:$true] %s301_s5 }
  0x51   :  { %v99_v20 = vrot.slane %v94_v17, %v98_v16  ;;  %v103_v25 = vrot.slane %v94_v17, %v102_v18  ;;  %s479_s19 = scalar_lea.vmem %s290_s14, 128  ;;  %p484_p5 = scmp.lt.s32.totalorder %s290_s14, %s290_s14 }
  0x52   :  { %364 = vmatpush3.bf16.msra.mxu1 %v389_v6  ;;  %133 = vmatpush1.bf16.msra.mxu0 %v390_v7  ;;  %p480_p4 = scmp.ne.s32.totalorder %s290_s14, %s479_s19  ;;  %p485_p6 = scmp.lt.s32.totalorder %s479_s19, %s479_s19 }
  0x54   :  { %p486_p7 = por %p485_p6, %p484_p5 }
  0x55   :  { %366 = vmatmul.mubr.msk.bf16.vlgmr.msra.gmra.mrb[0].mxu1 %vm126_vm1, %v89_v12  ;;  %326 = vmatmul.mubr.msk.bf16.vlgmr.msra.gmra.mrb[0].mxu0 %vm126_vm1, %v86_v13 }
  0x56   :  { %p487_p8 = pnand %p486_p7, %p480_p4 }
 0x128   :  { %v255_v21 = vpop.f32.mrb[0].mxu1  ;;  %v164_v23 = vpop.f32.mrb[0].mxu0 }
 0x129   :  { %v256_v22 = vadd.f32 %v331_v19, %v255_v21  ;;  %v367_v24 = vpop.f32.mrb[1].mxu1  ;;  %v165_v26 = vadd.f32 %v164_v23, %v99_v20  ;;  %v166_v27 = vpop.f32.mrb[1].mxu0 }
 0x12a   :  { %v258_v28 = vpop.f32.mrb[2].mxu1  ;;  %v168_v30 = vpop.f32.mrb[2].mxu0  ;;  %v167_v34 = vadd.f32 %v166_v27, %v103_v25 }
 0x12b   :  { %v259_v29 = vadd.f32 %v331_v19, %v258_v28  ;;  %v368_v31 = vpop.f32.mrb[3].mxu1  ;;  %v169_v32 = vadd.f32 %v168_v30, %v99_v20  ;;  %v170_v33 = vpop.f32.mrb[3].mxu0  ;;  %v173_v37 = vmul.f32 0.17677669, %v165_v26 }
 0x12c   :  { %v171_v36 = vadd.f32 %v170_v33, %v103_v25 }
 0x12d   :  { %v356_v35 = vpack.c.bf16 %v259_v29, %v256_v22  ;;  %v174_v38 = vmul.f32 0.17677669, %v169_v32 }
 0x12e   :  { %v351_v39 = vpack.c.bf16 %v171_v36, %v167_v34 }
 0x12f   :  { %357 = vst [vmem:[#allocation11] sm:$0xff] %v356_v35   ;;  %v346_v40 = vpack.c.bf16 %v174_v38, %v173_v37 }
 0x130   :  { %490 = shalt.err (!%p487_p8)
}
 0x131   :  { %s491_s0 = scalar_lea.hbm %s760_s7, 128 }
 0x132   :  { %p492_p9 = scmp.ne.s32.totalorder %s760_s7, %s491_s0  ;;  %p495_p10 = scmp.lt.u32.totalorder %s491_s0, %s760_s7 }
 0x134   :  { %p497_p11 = pnand %p495_p10, %p492_p9 }
 0x136   :  { %500 = shalt.err (!%p497_p11)
}
 0x137   :  { %295 = dma.vmem_to_hbm [thread:$0]  %s290_s14, 128, %s760_s7, [#allocation12], %s561_s2, %s561_s2, %s562_s17   ;;  %352 = vst [vmem:[#allocation13] sm:$0xff] %v351_v39   ;;  %347 = vst [vmem:[#allocation10] sm:$0xff] %v346_v40  }
 0x138   :  { %s501_s27 = scalar_lea.vmem %s696_s5, 128  ;;  %p506_p13 = scmp.lt.s32.totalorder %s696_s5, %s696_s5 }
 0x139   :  { %p502_p12 = scmp.ne.s32.totalorder %s696_s5, %s501_s27  ;;  %p507_p0 = scmp.lt.s32.totalorder %s501_s27, %s501_s27 }
 0x13b   :  { %p508_p1 = por %p507_p0, %p506_p13 }
 0x13d   :  { %p509_p2 = pnand %p508_p1, %p502_p12 }
 0x13f   :  { %512 = shalt.err (!%p509_p2)
}
 0x140   :  { %s513_s28 = scalar_lea.hbm %s761_s8, 128 }
 0x141   :  { %p514_p3 = scmp.ne.s32.totalorder %s761_s8, %s513_s28  ;;  %p517_p4 = scmp.lt.u32.totalorder %s513_s28, %s761_s8 }
 0x143   :  { %p519_p5 = pnand %p517_p4, %p514_p3 }
 0x145   :  { %522 = shalt.err (!%p519_p5)
}
 0x146   :  { %307 = dma.vmem_to_hbm [thread:$0]  %s696_s5, 128, %s761_s8, [#allocation12], %s561_s2, %s561_s2, %s562_s17  }
 0x147   :  { %s523_s12 = scalar_lea.vmem %s694_s15, 128  ;;  %p528_p7 = scmp.lt.s32.totalorder %s694_s15, %s694_s15 }
 0x148   :  { %p524_p6 = scmp.ne.s32.totalorder %s694_s15, %s523_s12  ;;  %p529_p8 = scmp.lt.s32.totalorder %s523_s12, %s523_s12 }
 0x14a   :  { %p530_p9 = por %p529_p8, %p528_p7 }
 0x14c   :  { %p531_p10 = pnand %p530_p9, %p524_p6 }
 0x14e   :  { %534 = shalt.err (!%p531_p10)
}
 0x14f   :  { %s535_s3 = scalar_lea.hbm %s759_s6, 128 }
 0x150   :  { %p536_p11 = scmp.ne.s32.totalorder %s759_s6, %s535_s3  ;;  %p539_p12 = scmp.lt.u32.totalorder %s535_s3, %s759_s6 }
 0x152   :  { %p541_p13 = pnand %p539_p12, %p536_p11 }
 0x154   :  { %544 = shalt.err (!%p541_p13)
}
 0x155   :  { %283 = dma.vmem_to_hbm [thread:$0]  %s694_s15, 128, %s759_s6, [#allocation4], %s561_s2, %s561_s2, %s562_s17  }
 0x156   :  { %551 = dma.done.wait [#allocation4], 128  }
 0x157   :  { %552 = vsyncadd [#allocation4], 4294967168 }
 0x158   :  { %553 = dma.done.wait [#allocation12], 256  }
 0x159   :  { %554 = vsyncadd [#allocation12], 4294967040 }
 0x15a   :  { %317 = vsyncpa [#allocation3], 1 }
 0x15b   :  { %318 = vsyncpa [#allocation6], 1 }
 0x15c   :  { %319 = vsyncpa [#allocation9], 1 }
 0x15d   :  { %320 = vsyncpa [#allocation4], 1 }
 0x15e   :  { %321 = vsyncpa [#allocation12], 1 }

</bundles_post_ra>
